<compile_context>
chip_gen: v6e
topology: v6e:2x2x1
jax: 0.10.0
libtpu: 0.0.40
codegen_flags: <defaults>
</compile_context>

<pallas_src>
import functools

import jax
import jax.numpy as jnp
from jax.experimental import pallas as pl
from jax.experimental.pallas import tpu as pltpu


def _round_up(x, m):
    return (x + m - 1) // m * m


def _logits_lse_kernel(x_ref, w_ref, b_ref, logits_ref, lse_ref, m_sc, l_sc):
    # x_ref: (tm, d_model)  w_ref: (d_model, tn)  b_ref: (1, tn)
    # logits_ref: (tm, tn) f32   lse_ref: (tm, 1) f32 (resident across vocab tiles)
    j = pl.program_id(1)

    @pl.when(j == 0)
    def _():
        m_sc[...] = jnp.full_like(m_sc, -jnp.inf)
        l_sc[...] = jnp.zeros_like(l_sc)

    # MXU matmul in the storage dtype, f32 accumulation.
    logits = jnp.dot(x_ref[...], w_ref[...], preferred_element_type=jnp.float32)
    logits = logits + b_ref[...].astype(jnp.float32)
    logits_ref[...] = logits

    # Online (running) log-sum-exp across vocab tiles.
    m_prev = m_sc[...]
    m_new = jnp.maximum(m_prev, jnp.max(logits, axis=-1, keepdims=True))
    l_sc[...] = (l_sc[...] * jnp.exp(m_prev - m_new)
                 + jnp.sum(jnp.exp(logits - m_new), axis=-1, keepdims=True))
    m_sc[...] = m_new

    @pl.when(j == pl.num_programs(1) - 1)
    def _():
        lse_ref[...] = m_sc[...] + jnp.log(l_sc[...])


def _subtract_lse_kernel(logits_ref, lse_ref, o_ref):
    # log_softmax = logits - logsumexp(logits)
    o_ref[...] = (logits_ref[...] - lse_ref[...]).astype(o_ref.dtype)


@functools.partial(jax.jit, static_argnames=("tm", "tn"))
def generator_forward(x, w_t, b, *, tm=256, tn=1024):
    """x: (batch, seq, d_model), w_t: (d_model, vocab) == torch W^T, b: (vocab,).

    Returns log-probabilities of shape (batch, seq, vocab) in x.dtype.
    """
    batch, seq, d_model = x.shape
    vocab = w_t.shape[1]
    m_total = batch * seq

    # Adapt tiles to small problems (sublane/lane alignment: 8 / 128).
    tm = min(tm, _round_up(m_total, 8))
    tn = min(tn, _round_up(vocab, 128))

    m_pad = _round_up(m_total, tm)
    n_pad = _round_up(vocab, tn)

    x2d = x.reshape(m_total, d_model)
    if m_pad != m_total:
        x2d = jnp.pad(x2d, ((0, m_pad - m_total), (0, 0)))
    if n_pad != vocab:
        w_t = jnp.pad(w_t, ((0, 0), (0, n_pad - vocab)))
        # Padded vocab columns get a very negative bias so exp() underflows to 0
        # and they do not perturb the log-sum-exp.
        b = jnp.pad(b, (0, n_pad - vocab), constant_values=-1e30)
    b2d = b.reshape(1, n_pad)

    grid = (m_pad // tm, n_pad // tn)

    cost = pl.CostEstimate(
        flops=2 * m_pad * d_model * n_pad,
        transcendentals=m_pad * n_pad,
        bytes_accessed=(x2d.size * x2d.dtype.itemsize
                        + w_t.size * w_t.dtype.itemsize
                        + b2d.size * b2d.dtype.itemsize
                        + m_pad * n_pad * 4
                        + m_pad * 4),
    )

    # Pass 1: logits tiles + per-row logsumexp (online across vocab tiles).
    logits, lse = pl.pallas_call(
        _logits_lse_kernel,
        out_shape=(jax.ShapeDtypeStruct((m_pad, n_pad), jnp.float32),
                   jax.ShapeDtypeStruct((m_pad, 1), jnp.float32)),
        grid_spec=pltpu.PrefetchScalarGridSpec(
            num_scalar_prefetch=0,
            grid=grid,
            in_specs=[
                pl.BlockSpec((tm, d_model), lambda i, j: (i, 0)),   # row tile of x
                pl.BlockSpec((d_model, tn), lambda i, j: (0, j)),   # vocab tile of W^T
                pl.BlockSpec((1, tn), lambda i, j: (0, j)),         # vocab tile of bias
            ],
            out_specs=[
                pl.BlockSpec((tm, tn), lambda i, j: (i, j)),        # raw logits
                pl.BlockSpec((tm, 1), lambda i, j: (i, 0)),         # per-row LSE
            ],
            scratch_shapes=[pltpu.VMEM((tm, 1), jnp.float32),       # running max
                            pltpu.VMEM((tm, 1), jnp.float32)],      # running sum
        ),
        compiler_params=pltpu.CompilerParams(
            dimension_semantics=("parallel", "arbitrary"),
            vmem_limit_bytes=64 * 1024 * 1024,
        ),
        cost_estimate=cost,
    )(x2d, w_t, b2d)

    # Pass 2: elementwise normalize (logits - lse), cast to output dtype.
    out = pl.pallas_call(
        _subtract_lse_kernel,
        out_shape=jax.ShapeDtypeStruct((m_pad, n_pad), x.dtype),
        grid_spec=pltpu.PrefetchScalarGridSpec(
            num_scalar_prefetch=0,
            grid=grid,
            in_specs=[
                pl.BlockSpec((tm, tn), lambda i, j: (i, j)),
                pl.BlockSpec((tm, 1), lambda i, j: (i, 0)),
            ],
            out_specs=pl.BlockSpec((tm, tn), lambda i, j: (i, j)),
        ),
        compiler_params=pltpu.CompilerParams(
            dimension_semantics=("parallel", "parallel"),
            vmem_limit_bytes=64 * 1024 * 1024,
        ),
    )(logits, lse)

    out = out[:m_total, :vocab]
    return out.reshape(batch, seq, vocab)


def init_generator_params(key, d_model, vocab, dtype=jnp.float32):
    """Deterministic init mimicking nn.Linear defaults (uniform(-1/sqrt(fan_in), ...))."""
    kw, kb = jax.random.split(key)
    bound = 1.0 / (d_model ** 0.5)
    # Store weight already transposed: (d_model, vocab) == torch W^T.
    w_t = jax.random.uniform(kw, (d_model, vocab), dtype, minval=-bound, maxval=bound)
    b = jax.random.uniform(kb, (vocab,), dtype, minval=-bound, maxval=bound)
    return w_t, b


if __name__ == "__main__":
    # Small shapes consistent with the module: Linear(d_model, vocab) + log_softmax.
    batch, seq, d_model, vocab = 2, 8, 32, 128

    key = jax.random.PRNGKey(0)
    kx, kp = jax.random.split(key)
    x = jax.random.normal(kx, (batch, seq, d_model), jnp.float32)
    w_t, b = init_generator_params(kp, d_model, vocab)

    out = generator_forward(x, w_t, b)
    out = jax.block_until_ready(out)

    # Sanity check against pure-JAX reference.
    ref = jax.nn.log_softmax(x @ w_t + b, axis=-1)
    assert out.shape == (batch, seq, vocab)
    assert jnp.allclose(out, ref, atol=1e-5, rtol=1e-5)
    # log_softmax rows should (log-)sum to 0.
    assert jnp.allclose(jax.scipy.special.logsumexp(out, axis=-1), 0.0, atol=1e-5)

    # Second check: shapes that exercise row padding and vocab padding/tiling.
    b2_, s2_, v2_ = 2, 5, 200
    x2 = jax.random.normal(jax.random.PRNGKey(1), (b2_, s2_, d_model), jnp.float32)
    w2, bias2 = init_generator_params(jax.random.PRNGKey(2), d_model, v2_)
    out2 = jax.block_until_ready(generator_forward(x2, w2, bias2, tn=128))
    ref2 = jax.nn.log_softmax(x2 @ w2 + bias2, axis=-1)
    assert out2.shape == (b2_, s2_, v2_)
    assert jnp.allclose(out2, ref2, atol=1e-4, rtol=1e-4)

    print("KERNEL_OK")
</pallas_src>

<mosaic_0001>
module attributes {stable_mosaic.version = 11 : i64} {
  func.func @_subtract_lse_kernel(%arg0: i32, %arg1: i32, %arg2: memref<16x128xf32, #tpu.memory_space<vmem>>, %arg3: memref<16x1xf32, #tpu.memory_space<vmem>>, %arg4: memref<16x128xf32, #tpu.memory_space<vmem>>) attributes {dimension_semantics = [#tpu.dimension_semantics<parallel>, #tpu.dimension_semantics<parallel>], iteration_bounds = array<i64: 1, 1>, scalar_prefetch = 0 : i64, scratch_operands = 0 : i64, tpu.core_type = #tpu.core_type<tc>, window_params = [{transform_indices = @transform_0, window_bounds = array<i64: 16, 128>}, {transform_indices = @transform_1, window_bounds = array<i64: 16, 1>}, {transform_indices = @transform_2, window_bounds = array<i64: 16, 128>}]} {
    %c0 = arith.constant 0 : index
    %c0_0 = arith.constant 0 : index
    %0 = vector.load %arg2[%c0, %c0_0] : memref<16x128xf32, #tpu.memory_space<vmem>>, vector<16x128xf32>
    %c0_1 = arith.constant 0 : index
    %c0_2 = arith.constant 0 : index
    %1 = vector.load %arg3[%c0_1, %c0_2] : memref<16x1xf32, #tpu.memory_space<vmem>>, vector<16x1xf32>
    %2 = vector.broadcast %1 : vector<16x1xf32> to vector<16x128xf32>
    %3 = arith.subf %0, %2 : vector<16x128xf32>
    %c0_3 = arith.constant 0 : index
    %c0_4 = arith.constant 0 : index
    %4 = vector.load %arg4[%c0_3, %c0_4] : memref<16x128xf32, #tpu.memory_space<vmem>>, vector<16x128xf32>
    tpu.vector_store %arg4[%c0_3, %c0_4], %3 {strides = array<i32>} : memref<16x128xf32, #tpu.memory_space<vmem>>, vector<16x128xf32>,
    return
  }
  func.func @transform_0(%arg0: i32, %arg1: i32) -> (i32, i32) {
    %c0_i32 = arith.constant 0 : i32
    return %arg0, %arg1 : i32, i32
  }
  func.func @transform_1(%arg0: i32, %arg1: i32) -> (i32, i32) {
    %c0_i32 = arith.constant 0 : i32
    %c0_i32_0 = arith.constant 0 : i32
    return %arg0, %c0_i32 : i32, i32
  }
  func.func @transform_2(%arg0: i32, %arg1: i32) -> (i32, i32) {
    %c0_i32 = arith.constant 0 : i32
    return %arg0, %arg1 : i32, i32
  }
}

module attributes {stable_mosaic.version = 11 : i64} {
  func.func @_logits_lse_kernel(%arg0: i32, %arg1: i32, %arg2: memref<16x32xf32, #tpu.memory_space<vmem>>, %arg3: memref<32x128xf32, #tpu.memory_space<vmem>>, %arg4: memref<1x128xf32, #tpu.memory_space<vmem>>, %arg5: memref<16x128xf32, #tpu.memory_space<vmem>>, %arg6: memref<16x1xf32, #tpu.memory_space<vmem>>, %arg7: memref<16x1xf32, #tpu.memory_space<vmem>>, %arg8: memref<16x1xf32, #tpu.memory_space<vmem>>) attributes {dimension_semantics = [#tpu.dimension_semantics<parallel>, #tpu.dimension_semantics<arbitrary>], iteration_bounds = array<i64: 1, 1>, scalar_prefetch = 0 : i64, scratch_operands = 2 : i64, tpu.core_type = #tpu.core_type<tc>, window_params = [{transform_indices = @transform_0, window_bounds = array<i64: 16, 32>}, {transform_indices = @transform_1, window_bounds = array<i64: 32, 128>}, {transform_indices = @transform_2, window_bounds = array<i64: 1, 128>}, {transform_indices = @transform_3, window_bounds = array<i64: 16, 128>}, {transform_indices = @transform_4, window_bounds = array<i64: 16, 1>}]} {
    %c0_i32 = arith.constant 0 : i32
    %0 = arith.cmpi eq, %arg1, %c0_i32 : i32
    %1 = arith.extui %0 : i1 to i32
    %c0_i32_0 = arith.constant 0 : i32
    %2 = arith.cmpi ne, %1, %c0_i32_0 : i32
    scf.if %2 {
      %cst_20 = arith.constant 0xFF800000 : f32
      %29 = vector.broadcast %cst_20 : f32 to vector<16x1xf32>
      %c0_21 = arith.constant 0 : index
      %c0_22 = arith.constant 0 : index
      %30 = vector.load %arg7[%c0_21, %c0_22] : memref<16x1xf32, #tpu.memory_space<vmem>>, vector<16x1xf32>
      tpu.vector_store %arg7[%c0_21, %c0_22], %29 {strides = array<i32>} : memref<16x1xf32, #tpu.memory_space<vmem>>, vector<16x1xf32>,
      %cst_23 = arith.constant 0.000000e+00 : f32
      %31 = vector.broadcast %cst_23 : f32 to vector<16x1xf32>
      %c0_24 = arith.constant 0 : index
      %c0_25 = arith.constant 0 : index
      %32 = vector.load %arg8[%c0_24, %c0_25] : memref<16x1xf32, #tpu.memory_space<vmem>>, vector<16x1xf32>
      tpu.vector_store %arg8[%c0_24, %c0_25], %31 {strides = array<i32>} : memref<16x1xf32, #tpu.memory_space<vmem>>, vector<16x1xf32>,
    } else {
    }
    %c0 = arith.constant 0 : index
    %c0_1 = arith.constant 0 : index
    %3 = vector.load %arg2[%c0, %c0_1] : memref<16x32xf32, #tpu.memory_space<vmem>>, vector<16x32xf32>
    %c0_2 = arith.constant 0 : index
    %c0_3 = arith.constant 0 : index
    %4 = vector.load %arg3[%c0_2, %c0_3] : memref<32x128xf32, #tpu.memory_space<vmem>>, vector<32x128xf32>
    %cst = arith.constant dense<0.000000e+00> : vector<16x128xf32>
    %5 = tpu.matmul %3, %4, %cst {dimension_numbers = #tpu.dot_dimension_numbers<[1], [0], [0], [1], [0, 0, 1, 1], [], []>} : vector<16x32xf32>, vector<32x128xf32>, vector<16x128xf32> -> vector<16x128xf32>
    %c0_4 = arith.constant 0 : index
    %c0_5 = arith.constant 0 : index
    %6 = vector.load %arg4[%c0_4, %c0_5] : memref<1x128xf32, #tpu.memory_space<vmem>>, vector<1x128xf32>
    %7 = vector.broadcast %6 : vector<1x128xf32> to vector<16x128xf32>
    %8 = arith.addf %5, %7 : vector<16x128xf32>
    %c0_6 = arith.constant 0 : index
    %c0_7 = arith.constant 0 : index
    %9 = vector.load %arg5[%c0_6, %c0_7] : memref<16x128xf32, #tpu.memory_space<vmem>>, vector<16x128xf32>
    tpu.vector_store %arg5[%c0_6, %c0_7], %8 {strides = array<i32>} : memref<16x128xf32, #tpu.memory_space<vmem>>, vector<16x128xf32>,
    %c0_8 = arith.constant 0 : index
    %c0_9 = arith.constant 0 : index
    %10 = vector.load %arg7[%c0_8, %c0_9] : memref<16x1xf32, #tpu.memory_space<vmem>>, vector<16x1xf32>
    %cst_10 = arith.constant dense<0xFF800000> : vector<16xf32>
    %11 = vector.multi_reduction <maximumf>, %8, %cst_10 [1] : vector<16x128xf32> to vector<16xf32>
    %12 = vector.shape_cast %11 : vector<16xf32> to vector<16x1xf32>
    %13 = arith.maximumf %10, %12 : vector<16x1xf32>
    %c0_11 = arith.constant 0 : index
    %c0_12 = arith.constant 0 : index
    %14 = vector.load %arg8[%c0_11, %c0_12] : memref<16x1xf32, #tpu.memory_space<vmem>>, vector<16x1xf32>
    %15 = arith.subf %10, %13 : vector<16x1xf32>
    %16 = math.exp %15 : vector<16x1xf32>
    %17 = arith.mulf %14, %16 : vector<16x1xf32>
    %18 = vector.broadcast %13 : vector<16x1xf32> to vector<16x128xf32>
    %19 = arith.subf %8, %18 : vector<16x128xf32>
    %20 = math.exp %19 : vector<16x128xf32>
    %cst_13 = arith.constant dense<0.000000e+00> : vector<16xf32>
    %21 = vector.multi_reduction <add>, %20, %cst_13 [1] : vector<16x128xf32> to vector<16xf32>
    %22 = vector.shape_cast %21 : vector<16xf32> to vector<16x1xf32>
    %23 = arith.addf %17, %22 : vector<16x1xf32>
    %c0_14 = arith.constant 0 : index
    %c0_15 = arith.constant 0 : index
    %24 = vector.load %arg8[%c0_14, %c0_15] : memref<16x1xf32, #tpu.memory_space<vmem>>, vector<16x1xf32>
    tpu.vector_store %arg8[%c0_14, %c0_15], %23 {strides = array<i32>} : memref<16x1xf32, #tpu.memory_space<vmem>>, vector<16x1xf32>,
    %c0_16 = arith.constant 0 : index
    %c0_17 = arith.constant 0 : index
    %25 = vector.load %arg7[%c0_16, %c0_17] : memref<16x1xf32, #tpu.memory_space<vmem>>, vector<16x1xf32>
    tpu.vector_store %arg7[%c0_16, %c0_17], %13 {strides = array<i32>} : memref<16x1xf32, #tpu.memory_space<vmem>>, vector<16x1xf32>,
    %c0_i32_18 = arith.constant 0 : i32
    %26 = arith.cmpi eq, %arg1, %c0_i32_18 : i32
    %27 = arith.extui %26 : i1 to i32
    %c0_i32_19 = arith.constant 0 : i32
    %28 = arith.cmpi ne, %27, %c0_i32_19 : i32
    scf.if %28 {
      %c0_20 = arith.constant 0 : index
      %c0_21 = arith.constant 0 : index
      %29 = vector.load %arg7[%c0_20, %c0_21] : memref<16x1xf32, #tpu.memory_space<vmem>>, vector<16x1xf32>
      %c0_22 = arith.constant 0 : index
      %c0_23 = arith.constant 0 : index
      %30 = vector.load %arg8[%c0_22, %c0_23] : memref<16x1xf32, #tpu.memory_space<vmem>>, vector<16x1xf32>
      %31 = math.log %30 : vector<16x1xf32>
      %32 = arith.addf %29, %31 : vector<16x1xf32>
      %c0_24 = arith.constant 0 : index
      %c0_25 = arith.constant 0 : index
      %33 = vector.load %arg6[%c0_24, %c0_25] : memref<16x1xf32, #tpu.memory_space<vmem>>, vector<16x1xf32>
      tpu.vector_store %arg6[%c0_24, %c0_25], %32 {strides = array<i32>} : memref<16x1xf32, #tpu.memory_space<vmem>>, vector<16x1xf32>,
    } else {
    }
    return
  }
  func.func @transform_0(%arg0: i32, %arg1: i32) -> (i32, i32) {
    %c0_i32 = arith.constant 0 : i32
    %c0_i32_0 = arith.constant 0 : i32
    return %arg0, %c0_i32 : i32, i32
  }
  func.func @transform_1(%arg0: i32, %arg1: i32) -> (i32, i32) {
    %c0_i32 = arith.constant 0 : i32
    %c0_i32_0 = arith.constant 0 : i32
    return %c0_i32, %arg1 : i32, i32
  }
  func.func @transform_2(%arg0: i32, %arg1: i32) -> (i32, i32) {
    %c0_i32 = arith.constant 0 : i32
    %c0_i32_0 = arith.constant 0 : i32
    return %c0_i32, %arg1 : i32, i32
  }
  func.func @transform_3(%arg0: i32, %arg1: i32) -> (i32, i32) {
    %c0_i32 = arith.constant 0 : i32
    return %arg0, %arg1 : i32, i32
  }
  func.func @transform_4(%arg0: i32, %arg1: i32) -> (i32, i32) {
    %c0_i32 = arith.constant 0 : i32
    %c0_i32_0 = arith.constant 0 : i32
    return %arg0, %c0_i32 : i32, i32
  }
}

</mosaic_0001>

<bundles_post_ra>
// kernel: generator_forward.3
= control target key start
LH: loop header
LB: loop body
LE: loop exit
PB: predicated region body
PF: predicated region fallthrough
CT: control target
= control target key end

     0   :  { %v73_v1 = vmov 0   ;;  %s107_s0 = inlined_call_operand.vmem [shape: f32[16,128], index: 0, kind: input, shape index: {}]   ;;  %s108_s1 = inlined_call_operand.vmem [shape: f32[16,1], index: 1, kind: input, shape index: {}]   ;;  %s109_s2 = inlined_call_operand.hbm [shape: f32[16,128], index: 2, kind: output, shape index: {}]  }
   0x1   :  { %v14_v0 = vld [vmem:[%s108_s1] sm:$0xff]  ;;  %50 = vset.pattern.permute.xlu0 %v73_v1 }
   0x2   :  { %7 = vsyncpa [#allocation3], 0  ;;  %18 = vperm.xlu0 %50, %v14_v0   ;;  %v15_v2 = vld [vmem:[%s108_s1 + $0x8] sm:$0xff]  ;;  %v12_v3 = vld [vmem:[%s107_s0] sm:$0xff]  ;;  %s74_s15 = smov [#allocation2]  }
   0x3   :  { %s35_s16 = sshll.u32 %s74_s15, 4  ;;  %v13_v6 = vld [vmem:[%s107_s0 + $0x8] sm:$0xff]  ;;  %s36_s16 = int_to_ptr.vmem [resolvable:$true] %s35_s16 }
   0x4   :  { %s51_s19 = scalar_lea.vmem %s36_s16, 256  ;;  %p56_p1 = scmp.lt.s32.totalorder %s36_s16, %s36_s16 }
   0x5   :  { %p52_p0 = scmp.ne.s32.totalorder %s36_s16, %s51_s19  ;;  %p57_p2 = scmp.lt.s32.totalorder %s51_s19, %s51_s19 }
   0x6   :  { %23 = vperm.xlu0 %50, %v15_v2  }
   0x7   :  { %p58_p3 = por %p57_p2, %p56_p1 }
   0x9   :  { %p59_p4 = pnand %p58_p3, %p52_p0 }
  0x7d   :  { %v19_v4 = vpop.permute.xlu0 %18 }
  0x7e   :  { %v26_v5 = vsub.f32 %v12_v3, %v19_v4 }
  0x80   :  { %28 = vst [vmem:[#allocation2] sm:$0xff] %v26_v5 }
  0x81   :  { %v24_v7 = vpop.permute.xlu0 %23 }
  0x82   :  { %v27_v8 = vsub.f32 %v13_v6, %v24_v7 }
  0x84   :  { %29 = vst [vmem:[#allocation2 + $0x8] sm:$0xff] %v27_v8 }
  0x85   :  { %62 = shalt.err (!%p59_p4)
}
  0x86   :  { %s75_s1 = smov 128   ;;  %s76_s20 = smov 8  }
  0x87   :  { %41 = dma.vmem_to_hbm [thread:$0]  %s36_s16, 256, %s109_s2, [#allocation3], %s75_s1, %s75_s1, %s76_s20  }
  0x88   :  { %71 = dma.done.wait [#allocation3], 256  }
  0x89   :  { %72 = vsyncadd [#allocation3], 4294967040 }
  0x8a   :  { %45 = vsyncpa [#allocation3], 1 }

// kernel: generator_forward.2
= control target key start
LH: loop header
LB: loop body
LE: loop exit
PB: predicated region body
PF: predicated region fallthrough
CT: control target
= control target key end

     0   :  { %10 = vsyncpa [#allocation5], 0  ;;  %s370_s0 = inlined_call_operand.hbm [shape: f32[16,32], index: 0, kind: input, shape index: {}]   ;;  %s371_s1 = inlined_call_operand.hbm [shape: f32[32,128], index: 1, kind: input, shape index: {}]   ;;  %s372_s2 = inlined_call_operand.vmem [shape: f32[1,128], index: 2, kind: input, shape index: {}]   ;;  %s373_s3 = inlined_call_operand.vmem [shape: f32[16,128], index: 3, kind: output, shape index: {0}]   ;;  %s374_s4 = inlined_call_operand.vmem [shape: f32[16,1], index: 4, kind: output, shape index: {1}]  }
   0x1   :  { %11 = vsyncpa [#allocation7], 0  ;;  %s305_s15 = smov [#allocation4]  }
   0x2   :  { %s17_s16 = sshll.u32 %s305_s15, 4  ;;  %s18_s16 = int_to_ptr.vmem [resolvable:$true] %s17_s16 }
   0x3   :  { %s269_s17 = scalar_lea.vmem %s18_s16, 256  ;;  %p274_p1 = scmp.lt.s32.totalorder %s18_s16, %s18_s16 }
   0x4   :  { %p270_p0 = scmp.ne.s32.totalorder %s18_s16, %s269_s17  ;;  %p275_p2 = scmp.lt.s32.totalorder %s269_s17, %s269_s17 }
   0x6   :  { %p276_p3 = por %p275_p2, %p274_p1 }
   0x8   :  { %p277_p4 = pnand %p276_p3, %p270_p0 }
   0xa   :  { %280 = shalt.err (!%p277_p4)
}
   0xb   :  { %s306_s18 = smov 128   ;;  %s307_s19 = smov 8  }
   0xc   :  { %23 = dma.hbm_to_vmem [thread:$0]  %s370_s0, 256, %s18_s16, [#allocation5], %s306_s18, %s306_s18, %s307_s19  }
   0xd   :  { %s308_s22 = smov [#allocation6]  }
   0xe   :  { %s29_s23 = sshll.u32 %s308_s22, 4  ;;  %s30_s23 = int_to_ptr.vmem [resolvable:$true] %s29_s23 }
   0xf   :  { %s289_s24 = scalar_lea.vmem %s30_s23, 512  ;;  %p294_p6 = scmp.lt.s32.totalorder %s30_s23, %s30_s23 }
  0x10   :  { %p290_p5 = scmp.ne.s32.totalorder %s30_s23, %s289_s24  ;;  %p295_p7 = scmp.lt.s32.totalorder %s289_s24, %s289_s24 }
  0x12   :  { %p296_p8 = por %p295_p7, %p294_p6 }
  0x14   :  { %p297_p9 = pnand %p296_p8, %p290_p5 }
  0x16   :  { %300 = shalt.err (!%p297_p9)
}
  0x17   :  { %35 = dma.hbm_to_vmem [thread:$0]  %s371_s1, 512, %s30_s23, [#allocation7], %s306_s18, %s306_s18, %s307_s19  }
  0x18   :  { %301 = dma.done.wait [#allocation5], 256  }
  0x19   :  { %302 = vsyncadd [#allocation5], 4294967040 }
  0x1a   :  { %303 = dma.done.wait [#allocation7], 512  }
  0x1b   :  { %304 = vsyncadd [#allocation7], 4294966784  ;;  %vm66_vm0 = vcmask 261120   ;;  %v58_v0 = vld [vmem:[#allocation6 + $0x18] sm:$0xff]  ;;  %v57_v1 = vld [vmem:[#allocation6 + $0x10] sm:$0xff]  ;;  %vm48_vm1 = vcmask 7168  }
  0x1c   :  { %229 = vmatprep.subr.mxu0 %v58_v0  ;;  %v53_v2 = vld [vmem:[#allocation4] sm:$0xff]  ;;  %v56_v3 = vld [vmem:[#allocation6 + $0x8] sm:$0xff]  ;;  %v55_v4 = vld [vmem:[#allocation6] sm:$0xff]  ;;  %v309_v6 = vmov -inf   ;;  %v310_v12 = vmov 0   ;;  %v311_v13 = vmov 0.0  }
  0x1d   :  { %230 = vmatpush3.msra.mxu0 %v58_v0  ;;  %237 = vmatprep.mubr.msk.f32.mxu0 %vm66_vm0, %v53_v2  ;;  %v54_v5 = vld [vmem:[#allocation4 + $0x8] sm:$0xff]  ;;  %49 = vst.msk [vmem:[#allocation2] sm:$0xff] %vm48_vm1, %v309_v6  ;;  %50 = vst.msk [vmem:[#allocation2 + $0x8] sm:$0xff] %vm48_vm1, %v309_v6  ;;  %v220_v7 = vld [vmem:[%s372_s2] ss:$0 sm:$0xff] }
  0x1e   :  { %231 = vmatprep.subr.mxu0 %v57_v1  ;;  %247 = vset.pattern.permute.xlu1 %v310_v12  ;;  %51 = vst.msk [vmem:[#allocation3] sm:$0xff] %vm48_vm1, %v311_v13  ;;  %52 = vst.msk [vmem:[#allocation3 + $0x8] sm:$0xff] %vm48_vm1, %v311_v13 }
  0x1f   :  { %232 = vmatpush3.msra.mxu0 %v57_v1  ;;  %248 = vset.pattern.permute.xlu0 %v310_v12 }
  0x20   :  { %233 = vmatprep.subr.mxu0 %v56_v3 }
  0x21   :  { %234 = vmatpush3.msra.mxu0 %v56_v3 }
  0x22   :  { %235 = vmatprep.subr.mxu0 %v55_v4 }
  0x23   :  { %236 = vmatpush3.msra.mxu0 %v55_v4 }
  0x24   :  { %238 = vmatmul.mubr.msk.f32.vlgmr.msra.gmra.mxu0 %vm66_vm0, %v54_v5  ;;  %v150_v14 = vld [vmem:[#allocation2] sm:$0xff]  ;;  %v151_v17 = vld [vmem:[#allocation2 + $0x8] sm:$0xff] }
  0x25   :  { %v158_v33 = vld [vmem:[#allocation3] sm:$0xff]  ;;  %v159_v37 = vld [vmem:[#allocation3 + $0x8] sm:$0xff] }
  0xe4   :  { %v239_v8 = vpop.f32.mrf.mxu0 }
  0xe5   :  { %v145_v9 = vadd.f32 %v239_v8, %v220_v7 }
  0xe6   :  { %v139_v10 = vpop.f32.mrf.mxu0 }
  0xe7   :  { %149 = vst [vmem:[%s373_s3 + $0x8] sm:$0xff] %v145_v9  ;;  %v140_v11 = vadd.f32 %v220_v7, %v139_v10 }
  0xe9   :  { %148 = vst [vmem:[%s373_s3] sm:$0xff] %v140_v11  ;;  %152 = vmax.xlane.f32.xlu0 %v140_v11 }
  0xed   :  { %154 = vmax.xlane.f32.xlu0 %v145_v9 }
 0x172   :  { %v153_v15 = vpop.xlane.xlu0 %152 }
 0x173   :  { %v156_v16 = vmax.f32 %v150_v14, %v153_v15 }
 0x175   :  { %v160_v18 = vsub.f32 %v150_v14, %v156_v16  ;;  %193 = vst.msk [vmem:[#allocation2] sm:$0xff] %vm48_vm1, %v156_v16  ;;  %170 = vperm.xlu1 %247, %v156_v16  }
 0x176   :  { %v155_v19 = vpop.xlane.xlu0 %154 }
 0x177   :  { %v157_v20 = vmax.f32 %v151_v17, %v155_v19  ;;  %v162_v30 = vmul.f32 1.442695, %v160_v18 }
 0x179   :  { %v161_v21 = vsub.f32 %v151_v17, %v157_v20  ;;  %194 = vst.msk [vmem:[#allocation2 + $0x8] sm:$0xff] %vm48_vm1, %v157_v20  ;;  %175 = vperm.xlu1 %247, %v157_v20  }
 0x17b   :  { %v164_v31 = vmul.f32 1.442695, %v161_v21 }
 0x17c   :  { %v198_v46 = vld [vmem:[#allocation2] sm:$0xff] }
 0x180   :  { %v199_v50 = vld [vmem:[#allocation2 + $0x8] sm:$0xff] }
 0x1f0   :  { %v171_v22 = vpop.permute.xlu1 %170 }
 0x1f1   :  { %v178_v23 = vsub.f32 %v140_v11, %v171_v22 }
 0x1f3   :  { %v180_v24 = vmul.f32 1.442695, %v178_v23 }
 0x1f4   :  { %v176_v25 = vpop.permute.xlu1 %175 }
 0x1f5   :  { %249 = vpow2.f32 %v180_v24  ;;  %v179_v26 = vsub.f32 %v145_v9, %v176_v25 }
 0x1f7   :  { %v182_v27 = vmul.f32 1.442695, %v179_v26 }
 0x1f9   :  { %251 = vpow2.f32 %v182_v27 }
 0x1fa   :  { %253 = vpow2.f32 %v162_v30 }
 0x1fb   :  { %255 = vpow2.f32 %v164_v31 }
 0x202   :  { %v250_v28 = vpop.eup %249 }
 0x203   :  { %184 = vadd.xlane.f32.xlu0 %v250_v28 }
 0x206   :  { %v252_v29 = vpop.eup %251 }
 0x207   :  { %186 = vadd.xlane.f32.xlu1 %v252_v29  ;;  %v254_v32 = vpop.eup %253 }
 0x208   :  { %v166_v34 = vmul.f32 %v254_v32, %v158_v33  ;;  %v256_v35 = vpop.eup %255 }
 0x209   :  { %v167_v39 = vmul.f32 %v256_v35, %v159_v37 }
 0x28c   :  { %v185_v36 = vpop.xlane.xlu0 %184 }
 0x28d   :  { %v188_v38 = vadd.f32 %v185_v36, %v166_v34 }
 0x28f   :  { %191 = vst.msk [vmem:[#allocation3] sm:$0xff] %vm48_vm1, %v188_v38 }
 0x290   :  { %v187_v40 = vpop.xlane.xlu1 %186 }
 0x291   :  { %v189_v41 = vadd.f32 %v187_v40, %v167_v39 }
 0x293   :  { %192 = vst.msk [vmem:[#allocation3 + $0x8] sm:$0xff] %vm48_vm1, %v189_v41 }
 0x296   :  { %v200_v42 = vld [vmem:[#allocation3] sm:$0xff] }
 0x297   :  { %257 = vlog2.f32 %v200_v42 }
 0x29a   :  { %v201_v43 = vld [vmem:[#allocation3 + $0x8] sm:$0xff] }
 0x29b   :  { %259 = vlog2.f32 %v201_v43 }
 0x2a4   :  { %v258_v44 = vpop.eup %257 }
 0x2a5   :  { %v203_v45 = vmul.f32 0.6931472, %v258_v44 }
 0x2a7   :  { %v206_v47 = vadd.f32 %v203_v45, %v198_v46 }
 0x2a8   :  { %v260_v48 = vpop.eup %259 }
 0x2a9   :  { %208 = vst.msk [vmem:[%s374_s4] sm:$0xff] %vm48_vm1, %v206_v47  ;;  %v205_v49 = vmul.f32 0.6931472, %v260_v48 }
 0x2ab   :  { %v207_v51 = vadd.f32 %v205_v49, %v199_v50 }
 0x2ad   :  { %209 = vst.msk [vmem:[%s374_s4 + $0x8] sm:$0xff] %vm48_vm1, %v207_v51 }
 0x2ae   :  { %218 = vsyncpa [#allocation5], 1 }
 0x2af   :  { %219 = vsyncpa [#allocation7], 1 }

</bundles_post_ra>
